<compile_context>
chip_gen: v5e
topology: v5e:2x2
jax: 0.10.0
libtpu: 0.0.40
codegen_flags: <defaults>
</compile_context>

<pallas_src>
import functools

import jax
import jax.numpy as jnp
from jax.experimental import pallas as pl
from jax.experimental.pallas import tpu as pltpu

IN_FEATURES = 28 * 28        # 784 (streams unpadded; Mosaic masks ragged K)
HIDDEN = 64
OUT_FEATURES = 3
OUT_PADDED = 8               # tiny lane pad 3 -> 8 so the output block is legal


def _round_up(n, m):
    return ((n + m - 1) // m) * m


def encoder_kernel(x_ref, w1_ref, b1_ref, w2_ref, b2_ref, o_ref):
    # Fused MLP on one batch tile: matmul -> bias -> ReLU -> matmul -> bias.
    h = jnp.dot(x_ref[...], w1_ref[...],
                preferred_element_type=jnp.float32)        # (TB, 64) f32 acc
    h = jnp.maximum(h + b1_ref[...], 0.0)                  # bias + ReLU in f32
    y = jnp.dot(h.astype(w2_ref.dtype), w2_ref[...],
                preferred_element_type=jnp.float32)        # (TB, 8) f32 acc
    o_ref[...] = (y + b2_ref[...]).astype(o_ref.dtype)


@functools.partial(jax.jit, static_argnames=("block_b", "use_bf16"))
def encoder_forward(x, w1, b1, w2, b2, *, block_b=2048, use_bf16=True):
    """x: (B, 784). w1: (784, 64), b1: (1, 64), w2: (64, 3), b2: (1, 3).

    Returns (B, 3) float32. Weights are (in, out), i.e. transposed vs
    PyTorch's nn.Linear storage, so the kernel computes x @ W + b.
    """
    B = x.shape[0]
    assert x.shape[1] == IN_FEATURES
    assert block_b >= 1

    # ---- dtype plumbing (NO feature/batch padding of x: it streams as-is) ---
    xk, w1k, w2k = x, w1, w2
    if use_bf16:
        # bf16 operands on the HBM-bound stream; accumulation stays f32
        # in-kernel. Best case the producer already supplies bf16 x, making
        # this cast a no-op (no extra HBM pass).
        if xk.dtype != jnp.bfloat16:
            xk = xk.astype(jnp.bfloat16)
        w1k = w1k.astype(jnp.bfloat16)
        w2k = w2k.astype(jnp.bfloat16)
    # Lane pad of the second linear only (3 -> 8): 20 extra weight floats,
    # output store is 32 B/row instead of 512 B/row.
    w2p = jnp.pad(w2k, ((0, 0), (0, OUT_PADDED - OUT_FEATURES)))
    b2p = jnp.pad(b2, ((0, 0), (0, OUT_PADDED - OUT_FEATURES)))

    # ---- batch tile: multiple of 8 sublanes; prefer >= 2 grid steps so the
    #      "parallel" axis can shard across v7x's two TensorCores ------------
    tb = _round_up(min(block_b, max(B, 1)), 8)
    if B > 8 and pl.cdiv(B, tb) < 2:
        tb = _round_up(pl.cdiv(B, 2), 8)
    grid = (pl.cdiv(B, tb),)   # last block is clipped; rows are independent

    # ---- VMEM budget (x/out and resident weights, double-buffered) ---------
    x_itemsize = jnp.dtype(xk.dtype).itemsize
    w_itemsize = jnp.dtype(w1k.dtype).itemsize
    x_tile_bytes = tb * IN_FEATURES * x_itemsize
    out_tile_bytes = tb * OUT_PADDED * 4
    weight_bytes = ((IN_FEATURES * HIDDEN + HIDDEN * OUT_PADDED) * w_itemsize
                    + (HIDDEN + OUT_PADDED) * 4)
    vmem_need = 2 * (x_tile_bytes + out_tile_bytes + weight_bytes)
    vmem_limit = None
    if vmem_need > (12 << 20):
        # v5e's default scoped VMEM is only 16 MiB; raise explicitly, but cap
        # at v7x's 64 MiB physical VMEM so big block_b never over-asks there.
        vmem_limit = min(int(vmem_need * 1.25) + (2 << 20), 64 << 20)

    # ---- advisory cost: memory-dominated, so XLA overlaps neighbours -------
    flops = 2 * B * (IN_FEATURES * HIDDEN + HIDDEN * OUT_PADDED)
    bytes_accessed = B * (IN_FEATURES * x_itemsize + OUT_PADDED * 4) + weight_bytes
    cost = pl.CostEstimate(flops=flops, transcendentals=0,
                           bytes_accessed=bytes_accessed)

    out = pl.pallas_call(
        encoder_kernel,
        out_shape=jax.ShapeDtypeStruct((B, OUT_PADDED), jnp.float32),
        grid=grid,
        in_specs=[
            pl.BlockSpec((tb, IN_FEATURES), lambda i: (i, 0)),       # x streamed
            pl.BlockSpec((IN_FEATURES, HIDDEN), lambda i: (0, 0)),   # w1 resident
            pl.BlockSpec((1, HIDDEN), lambda i: (0, 0)),             # b1 resident
            pl.BlockSpec((HIDDEN, OUT_PADDED), lambda i: (0, 0)),    # w2 resident
            pl.BlockSpec((1, OUT_PADDED), lambda i: (0, 0)),         # b2 resident
        ],
        out_specs=pl.BlockSpec((tb, OUT_PADDED), lambda i: (i, 0)),
        compiler_params=pltpu.CompilerParams(
            dimension_semantics=("parallel",),
            vmem_limit_bytes=vmem_limit),
        cost_estimate=cost,
    )(xk, w1k, b1, w2p, b2p)

    # Only the tiny 8->3 lane slice remains (32 B/row re-read); no batch slice.
    return out[:, :OUT_FEATURES]


def init_params(key):
    """Deterministic init mimicking PyTorch's default Linear init
    (uniform(-1/sqrt(fan_in), 1/sqrt(fan_in)))."""
    k1, k2, k3, k4 = jax.random.split(key, 4)
    bound1 = 1.0 / (IN_FEATURES ** 0.5)
    bound2 = 1.0 / (HIDDEN ** 0.5)
    w1 = jax.random.uniform(k1, (IN_FEATURES, HIDDEN), jnp.float32,
                            minval=-bound1, maxval=bound1)
    b1 = jax.random.uniform(k2, (1, HIDDEN), jnp.float32,
                            minval=-bound1, maxval=bound1)
    w2 = jax.random.uniform(k3, (HIDDEN, OUT_FEATURES), jnp.float32,
                            minval=-bound2, maxval=bound2)
    b2 = jax.random.uniform(k4, (1, OUT_FEATURES), jnp.float32,
                            minval=-bound2, maxval=bound2)
    return w1, b1, w2, b2


def _reference(x, w1, b1, w2, b2):
    return jnp.maximum(x @ w1 + b1, 0.0) @ w2 + b2


if __name__ == "__main__":
    key = jax.random.PRNGKey(0)
    k_x1, k_x2, k_p = jax.random.split(key, 3)
    w1, b1, w2, b2 = init_params(k_p)

    # Case 1: small batch, single grid step, f32 operands (tight tolerance).
    B1 = 8
    x1 = jax.random.normal(k_x1, (B1, IN_FEATURES), jnp.float32)
    out1 = jax.block_until_ready(
        encoder_forward(x1, w1, b1, w2, b2, use_bf16=False))
    ref1 = _reference(x1, w1, b1, w2, b2)
    assert out1.shape == (B1, OUT_FEATURES)
    assert jnp.allclose(out1, ref1, atol=1e-5, rtol=1e-5)

    # Case 2: ragged batch (not a multiple of the tile) + multi-step grid,
    # f32 operands — exercises partial-block clipping instead of batch padding
    # and the unpadded K=784 contraction against the pure-JAX reference.
    B2 = 200
    x2 = jax.random.normal(k_x2, (B2, IN_FEATURES), jnp.float32)
    out2 = jax.block_until_ready(
        encoder_forward(x2, w1, b1, w2, b2, block_b=64, use_bf16=False))
    ref2 = _reference(x2, w1, b1, w2, b2)
    assert out2.shape == (B2, OUT_FEATURES)
    assert jnp.allclose(out2, ref2, atol=1e-5, rtol=1e-5)

    # Case 3: default path (bf16 operands, f32 accumulation, auto >=2 grid
    # steps) — looser tolerance for the bf16 quantisation of x / w1 / w2 / h.
    out3 = jax.block_until_ready(encoder_forward(x2, w1, b1, w2, b2))
    assert out3.shape == (B2, OUT_FEATURES)
    assert jnp.allclose(out3, ref2, atol=5e-2, rtol=5e-2)

    print("KERNEL_OK")
</pallas_src>

<mosaic_0001>
module attributes {stable_mosaic.version = 11 : i64} {
  func.func @encoder_kernel(%arg0: i32, %arg1: memref<8x784xf32, #tpu.memory_space<vmem>>, %arg2: memref<784x64xf32, #tpu.memory_space<vmem>>, %arg3: memref<1x64xf32, #tpu.memory_space<vmem>>, %arg4: memref<64x8xf32, #tpu.memory_space<vmem>>, %arg5: memref<1x8xf32, #tpu.memory_space<vmem>>, %arg6: memref<8x8xf32, #tpu.memory_space<vmem>>) attributes {dimension_semantics = [#tpu.dimension_semantics<parallel>], iteration_bounds = array<i64: 1>, scalar_prefetch = 0 : i64, scratch_operands = 0 : i64, tpu.core_type = #tpu.core_type<tc>, window_params = [{transform_indices = @transform_0, window_bounds = array<i64: 8, 784>}, {pipeline_mode = #tpu.pipeline_mode<synchronous>, transform_indices = @transform_1, window_bounds = array<i64: 784, 64>}, {pipeline_mode = #tpu.pipeline_mode<synchronous>, transform_indices = @transform_2, window_bounds = array<i64: 1, 64>}, {pipeline_mode = #tpu.pipeline_mode<synchronous>, transform_indices = @transform_3, window_bounds = array<i64: 64, 8>}, {pipeline_mode = #tpu.pipeline_mode<synchronous>, transform_indices = @transform_4, window_bounds = array<i64: 1, 8>}, {transform_indices = @transform_5, window_bounds = array<i64: 8, 8>}]} {
    %c0 = arith.constant 0 : index
    %c0_0 = arith.constant 0 : index
    %0 = vector.load %arg1[%c0, %c0_0] : memref<8x784xf32, #tpu.memory_space<vmem>>, vector<8x784xf32>
    %c0_1 = arith.constant 0 : index
    %c0_2 = arith.constant 0 : index
    %1 = vector.load %arg2[%c0_1, %c0_2] : memref<784x64xf32, #tpu.memory_space<vmem>>, vector<784x64xf32>
    %cst = arith.constant dense<0.000000e+00> : vector<8x64xf32>
    %2 = tpu.matmul %0, %1, %cst {dimension_numbers = #tpu.dot_dimension_numbers<[1], [0], [0], [1], [0, 0, 1, 1], [], []>} : vector<8x784xf32>, vector<784x64xf32>, vector<8x64xf32> -> vector<8x64xf32>
    %c0_3 = arith.constant 0 : index
    %c0_4 = arith.constant 0 : index
    %3 = vector.load %arg3[%c0_3, %c0_4] : memref<1x64xf32, #tpu.memory_space<vmem>>, vector<1x64xf32>
    %4 = vector.broadcast %3 : vector<1x64xf32> to vector<8x64xf32>
    %5 = arith.addf %2, %4 : vector<8x64xf32>
    %cst_5 = arith.constant 0.000000e+00 : f32
    %6 = vector.broadcast %cst_5 : f32 to vector<8x64xf32>
    %7 = arith.maximumf %5, %6 : vector<8x64xf32>
    %c0_6 = arith.constant 0 : index
    %c0_7 = arith.constant 0 : index
    %8 = vector.load %arg4[%c0_6, %c0_7] : memref<64x8xf32, #tpu.memory_space<vmem>>, vector<64x8xf32>
    %cst_8 = arith.constant dense<0.000000e+00> : vector<8x8xf32>
    %9 = tpu.matmul %7, %8, %cst_8 {dimension_numbers = #tpu.dot_dimension_numbers<[1], [0], [0], [1], [0, 0, 1, 1], [], []>} : vector<8x64xf32>, vector<64x8xf32>, vector<8x8xf32> -> vector<8x8xf32>
    %c0_9 = arith.constant 0 : index
    %c0_10 = arith.constant 0 : index
    %10 = vector.load %arg5[%c0_9, %c0_10] : memref<1x8xf32, #tpu.memory_space<vmem>>, vector<1x8xf32>
    %11 = vector.broadcast %10 : vector<1x8xf32> to vector<8x8xf32>
    %12 = arith.addf %9, %11 : vector<8x8xf32>
    %c0_11 = arith.constant 0 : index
    %c0_12 = arith.constant 0 : index
    %13 = vector.load %arg6[%c0_11, %c0_12] : memref<8x8xf32, #tpu.memory_space<vmem>>, vector<8x8xf32>
    tpu.vector_store %arg6[%c0_11, %c0_12], %12 {strides = array<i32>} : memref<8x8xf32, #tpu.memory_space<vmem>>, vector<8x8xf32>,
    return
  }
  func.func @transform_0(%arg0: i32) -> (i32, i32) {
    %c0_i32 = arith.constant 0 : i32
    %c0_i32_0 = arith.constant 0 : i32
    return %arg0, %c0_i32 : i32, i32
  }
  func.func @transform_1(%arg0: i32) -> (i32, i32) {
    %c0_i32 = arith.constant 0 : i32
    %c0_i32_0 = arith.constant 0 : i32
    %c0_i32_1 = arith.constant 0 : i32
    return %c0_i32, %c0_i32_0 : i32, i32
  }
  func.func @transform_2(%arg0: i32) -> (i32, i32) {
    %c0_i32 = arith.constant 0 : i32
    %c0_i32_0 = arith.constant 0 : i32
    %c0_i32_1 = arith.constant 0 : i32
    return %c0_i32, %c0_i32_0 : i32, i32
  }
  func.func @transform_3(%arg0: i32) -> (i32, i32) {
    %c0_i32 = arith.constant 0 : i32
    %c0_i32_0 = arith.constant 0 : i32
    %c0_i32_1 = arith.constant 0 : i32
    return %c0_i32, %c0_i32_0 : i32, i32
  }
  func.func @transform_4(%arg0: i32) -> (i32, i32) {
    %c0_i32 = arith.constant 0 : i32
    %c0_i32_0 = arith.constant 0 : i32
    %c0_i32_1 = arith.constant 0 : i32
    return %c0_i32, %c0_i32_0 : i32, i32
  }
  func.func @transform_5(%arg0: i32) -> (i32, i32) {
    %c0_i32 = arith.constant 0 : i32
    %c0_i32_0 = arith.constant 0 : i32
    return %arg0, %c0_i32 : i32, i32
  }
}

</mosaic_0001>

<bundles_post_ra>
// kernel: encoder_forward.1
= control target key start
LH: loop header
LB: loop body
LE: loop exit
PB: predicated region body
PF: predicated region fallthrough
CT: control target
= control target key end

     0   :  { %vm129_vm0 = vcmask 130048   ;;  %vm286_vm1 = vcmask 523264   ;;  %vm310_vm2 = vcmask 64512   ;;  %s698_s1 = inlined_call_operand.vmem [shape: f32[784,64], index: 1, kind: input, shape index: {}]   ;;  %s699_s2 = inlined_call_operand.vmem [shape: f32[1,64], index: 2, kind: input, shape index: {}]   ;;  %s700_s0 = inlined_call_operand.vmem [shape: f32[8,784], index: 0, kind: input, shape index: {}]   ;;  %s701_s4 = inlined_call_operand.vmem [shape: f32[1,8], index: 4, kind: input, shape index: {}]   ;;  %s702_s3 = inlined_call_operand.vmem [shape: f32[64,8], index: 3, kind: input, shape index: {}]   ;;  %s703_s5 = inlined_call_operand.vmem [shape: f32[8,8], index: 5, kind: output, shape index: {}]  }
   0x1   :  { %v42_v0 = vld [vmem:[%s698_s1 + $0x78] sm:$0xff]  ;;  %v41_v1 = vld [vmem:[%s698_s1 + $0x70] sm:$0xff]  ;;  %v40_v4 = vld [vmem:[%s698_s1 + $0x68] sm:$0xff] }
   0x2   :  { %v58_v2 = vld [vmem:[%s698_s1 + $0xf8] sm:$0xff]  ;;  %133 = vmatpush.msra.mxu0 %v42_v0  ;;  %v57_v3 = vld [vmem:[%s698_s1 + $0xf0] sm:$0xff]  ;;  %v56_v5 = vld [vmem:[%s698_s1 + $0xe8] sm:$0xff] }
   0x3   :  { %153 = vmatpush.msra.mxu1 %v58_v2  ;;  %v39_v6 = vld [vmem:[%s698_s1 + $0x60] sm:$0xff]  ;;  %v38_v8 = vld [vmem:[%s698_s1 + $0x58] sm:$0xff]  ;;  %v37_v10 = vld [vmem:[%s698_s1 + $0x50] sm:$0xff] }
   0x4   :  { %134 = vmatpush.msra.mxu0 %v41_v1  ;;  %v55_v7 = vld [vmem:[%s698_s1 + $0xe0] sm:$0xff]  ;;  %v54_v9 = vld [vmem:[%s698_s1 + $0xd8] sm:$0xff]  ;;  %v53_v12 = vld [vmem:[%s698_s1 + $0xd0] sm:$0xff] }
   0x5   :  { %154 = vmatpush.msra.mxu1 %v57_v3  ;;  %v74_v11 = vld [vmem:[%s698_s1 + $0x178] sm:$0xff]  ;;  %v73_v13 = vld [vmem:[%s698_s1 + $0x170] sm:$0xff]  ;;  %v72_v15 = vld [vmem:[%s698_s1 + $0x168] sm:$0xff] }
   0x6   :  { %135 = vmatpush.msra.mxu0 %v40_v4  ;;  %173 = vmatpush.msra.mxu2 %v74_v11  ;;  %v90_v14 = vld [vmem:[%s698_s1 + $0x1f8] sm:$0xff]  ;;  %v89_v16 = vld [vmem:[%s698_s1 + $0x1f0] sm:$0xff]  ;;  %v36_v17 = vld [vmem:[%s698_s1 + $0x48] sm:$0xff] }
   0x7   :  { %155 = vmatpush.msra.mxu1 %v56_v5  ;;  %v52_v18 = vld [vmem:[%s698_s1 + $0xc8] sm:$0xff]  ;;  %193 = vmatpush.msra.mxu3 %v90_v14  ;;  %v71_v19 = vld [vmem:[%s698_s1 + $0x160] sm:$0xff]  ;;  %v70_v23 = vld [vmem:[%s698_s1 + $0x158] sm:$0xff] }
   0x8   :  { %136 = vmatpush.msra.mxu0 %v39_v6  ;;  %174 = vmatpush.msra.mxu2 %v73_v13  ;;  %v88_v20 = vld [vmem:[%s698_s1 + $0x1e8] sm:$0xff]  ;;  %v35_v21 = vld [vmem:[%s698_s1 + $0x40] sm:$0xff]  ;;  %v34_v25 = vld [vmem:[%s698_s1 + $0x38] sm:$0xff] }
   0x9   :  { %156 = vmatpush.msra.mxu1 %v55_v7  ;;  %v51_v22 = vld [vmem:[%s698_s1 + $0xc0] sm:$0xff]  ;;  %194 = vmatpush.msra.mxu3 %v89_v16  ;;  %v50_v26 = vld [vmem:[%s698_s1 + $0xb8] sm:$0xff]  ;;  %v69_v27 = vld [vmem:[%s698_s1 + $0x150] sm:$0xff] }
   0xa   :  { %137 = vmatpush.msra.mxu0 %v38_v8  ;;  %175 = vmatpush.msra.mxu2 %v72_v15  ;;  %v87_v24 = vld [vmem:[%s698_s1 + $0x1e0] sm:$0xff]  ;;  %v86_v28 = vld [vmem:[%s698_s1 + $0x1d8] sm:$0xff]  ;;  %v33_v29 = vld [vmem:[%s698_s1 + $0x30] sm:$0xff] }
   0xb   :  { %157 = vmatpush.msra.mxu1 %v54_v9  ;;  %195 = vmatpush.msra.mxu3 %v88_v20  ;;  %v49_v30 = vld [vmem:[%s698_s1 + $0xb0] sm:$0xff]  ;;  %v68_v31 = vld [vmem:[%s698_s1 + $0x148] sm:$0xff]  ;;  %v67_v35 = vld [vmem:[%s698_s1 + $0x140] sm:$0xff] }
   0xc   :  { %138 = vmatpush.msra.mxu0 %v37_v10  ;;  %176 = vmatpush.msra.mxu2 %v71_v19  ;;  %v85_v32 = vld [vmem:[%s698_s1 + $0x1d0] sm:$0xff]  ;;  %v32_v33 = vld [vmem:[%s698_s1 + $0x28] sm:$0xff]  ;;  %v31_v37 = vld [vmem:[%s698_s1 + $0x20] sm:$0xff] }
   0xd   :  { %158 = vmatpush.msra.mxu1 %v53_v12  ;;  %196 = vmatpush.msra.mxu3 %v87_v24  ;;  %v48_v34 = vld [vmem:[%s698_s1 + $0xa8] sm:$0xff]  ;;  %v47_v38 = vld [vmem:[%s698_s1 + $0xa0] sm:$0xff]  ;;  %v66_v39 = vld [vmem:[%s698_s1 + $0x138] sm:$0xff] }
   0xe   :  { %139 = vmatpush.msra.mxu0 %v36_v17  ;;  %177 = vmatpush.msra.mxu2 %v70_v23  ;;  %v84_v36 = vld [vmem:[%s698_s1 + $0x1c8] sm:$0xff]  ;;  %v83_v40 = vld [vmem:[%s698_s1 + $0x1c0] sm:$0xff]  ;;  %v30_v41 = vld [vmem:[%s698_s1 + $0x18] sm:$0xff] }
   0xf   :  { %159 = vmatpush.msra.mxu1 %v52_v18  ;;  %197 = vmatpush.msra.mxu3 %v86_v28  ;;  %v46_v42 = vld [vmem:[%s698_s1 + $0x98] sm:$0xff]  ;;  %v65_v43 = vld [vmem:[%s698_s1 + $0x130] sm:$0xff]  ;;  %v64_v47 = vld [vmem:[%s698_s1 + $0x128] sm:$0xff] }
  0x10   :  { %140 = vmatpush.msra.mxu0 %v35_v21  ;;  %178 = vmatpush.msra.mxu2 %v69_v27  ;;  %v82_v44 = vld [vmem:[%s698_s1 + $0x1b8] sm:$0xff]  ;;  %v29_v45 = vld [vmem:[%s698_s1 + $0x10] sm:$0xff]  ;;  %v28_v49 = vld [vmem:[%s698_s1 + $0x8] sm:$0xff] }
  0x11   :  { %160 = vmatpush.msra.mxu1 %v51_v22  ;;  %198 = vmatpush.msra.mxu3 %v85_v32  ;;  %v45_v46 = vld [vmem:[%s698_s1 + $0x90] sm:$0xff]  ;;  %v44_v50 = vld [vmem:[%s698_s1 + $0x88] sm:$0xff]  ;;  %v63_v51 = vld [vmem:[%s698_s1 + $0x120] sm:$0xff] }
  0x12   :  { %141 = vmatpush.msra.mxu0 %v34_v25  ;;  %179 = vmatpush.msra.mxu2 %v68_v31  ;;  %v81_v48 = vld [vmem:[%s698_s1 + $0x1b0] sm:$0xff]  ;;  %v80_v52 = vld [vmem:[%s698_s1 + $0x1a8] sm:$0xff]  ;;  %v27_v53 = vld [vmem:[%s698_s1] sm:$0xff] }
  0x13   :  { %161 = vmatpush.msra.mxu1 %v50_v26  ;;  %199 = vmatpush.msra.mxu3 %v84_v36  ;;  %v43_v54 = vld [vmem:[%s698_s1 + $0x80] sm:$0xff]  ;;  %v106_v55 = vld [vmem:[%s698_s1 + $0x278] sm:$0xff]  ;;  %v105_v59 = vld [vmem:[%s698_s1 + $0x270] sm:$0xff] }
  0x14   :  { %142 = vmatpush.msra.mxu0 %v33_v29  ;;  %180 = vmatpush.msra.mxu2 %v67_v35  ;;  %v122_v56 = vld [vmem:[%s698_s1 + $0x2f8] sm:$0xff]  ;;  %v79_v58 = vld [vmem:[%s698_s1 + $0x1a0] sm:$0xff]  ;;  %v121_v60 = vld [vmem:[%s698_s1 + $0x2f0] sm:$0xff] }
  0x15   :  { %162 = vmatpush.msra.mxu1 %v49_v30  ;;  %200 = vmatpush.msra.mxu3 %v83_v40  ;;  %v62_v57 = vld [vmem:[%s698_s1 + $0x118] sm:$0xff]  ;;  %v61_v61 = vld [vmem:[%s698_s1 + $0x110] sm:$0xff]  ;;  %v104_v63 = vld [vmem:[%s698_s1 + $0x268] sm:$0xff] }
  0x16   :  { %143 = vmatpush.msra.mxu0 %v32_v33  ;;  %181 = vmatpush.msra.mxu2 %v66_v39  ;;  %v78_v62 = vld [vmem:[%s698_s1 + $0x198] sm:$0xff]  ;;  %v120_v0 = vld [vmem:[%s698_s1 + $0x2e8] sm:$0xff]  ;;  %v77_v2 = vld [vmem:[%s698_s1 + $0x190] sm:$0xff] }
  0x17   :  { %163 = vmatpush.msra.mxu1 %v48_v34  ;;  %201 = vmatpush.msra.mxu3 %v82_v44  ;;  %v60_v1 = vld [vmem:[%s698_s1 + $0x108] sm:$0xff]  ;;  %v103_v3 = vld [vmem:[%s698_s1 + $0x260] sm:$0xff]  ;;  %v102_v7 = vld [vmem:[%s698_s1 + $0x258] sm:$0xff] }
  0x18   :  { %144 = vmatpush.msra.mxu0 %v31_v37  ;;  %182 = vmatpush.msra.mxu2 %v65_v43  ;;  %v119_v4 = vld [vmem:[%s698_s1 + $0x2e0] sm:$0xff]  ;;  %v76_v6 = vld [vmem:[%s698_s1 + $0x188] sm:$0xff]  ;;  %v118_v8 = vld [vmem:[%s698_s1 + $0x2d8] sm:$0xff] }
  0x19   :  { %164 = vmatpush.msra.mxu1 %v47_v38  ;;  %202 = vmatpush.msra.mxu3 %v81_v48  ;;  %v59_v5 = vld [vmem:[%s698_s1 + $0x100] sm:$0xff]  ;;  %v22_v9 = vld [vmem:[%s700_s0 + $0x10] sm:$0xff]  ;;  %v124_v13 = vld [vmem:[%s698_s1 + $0x308] sm:$0xff] }
  0x1a   :  { %145 = vmatpush.msra.mxu0 %v30_v41  ;;  %183 = vmatpush.msra.mxu2 %v64_v47  ;;  %v75_v10 = vld [vmem:[%s698_s1 + $0x180] sm:$0xff]  ;;  %v101_v11 = vld [vmem:[%s698_s1 + $0x250] sm:$0xff]  ;;  %v100_v15 = vld [vmem:[%s698_s1 + $0x248] sm:$0xff] }
  0x1b   :  { %165 = vmatpush.msra.mxu1 %v46_v42  ;;  %203 = vmatpush.msra.mxu3 %v80_v52  ;;  %v117_v12 = vld [vmem:[%s698_s1 + $0x2d0] sm:$0xff]  ;;  %v20_v14 = vld [vmem:[%s700_s0] sm:$0xff]  ;;  %v116_v16 = vld [vmem:[%s698_s1 + $0x2c8] sm:$0xff] }
  0x1c   :  { %146 = vmatpush.msra.mxu0 %v29_v45  ;;  %184 = vmatpush.msra.mxu2 %v63_v51  ;;  %v23_v17 = vld [vmem:[%s700_s0 + $0x18] sm:$0xff]  ;;  %v21_v18 = vld [vmem:[%s700_s0 + $0x8] sm:$0xff]  ;;  %v99_v19 = vld [vmem:[%s698_s1 + $0x240] sm:$0xff] }
  0x1d   :  { %166 = vmatpush.msra.mxu1 %v45_v46  ;;  %204 = vmatpush.msra.mxu3 %v79_v58  ;;  %v115_v20 = vld [vmem:[%s698_s1 + $0x2c0] sm:$0xff]  ;;  %v98_v22 = vld [vmem:[%s698_s1 + $0x238] sm:$0xff]  ;;  %v26_v24 = vld [vmem:[%s700_s0 + $0x30] sm:$0xff] }
  0x1e   :  { %147 = vmatpush.msra.mxu0 %v28_v49  ;;  %185 = vmatpush.msra.mxu2 %v62_v57  ;;  %v123_v21 = vld [vmem:[%s698_s1 + $0x300] sm:$0xff]  ;;  %v114_v23 = vld [vmem:[%s698_s1 + $0x2b8] sm:$0xff]  ;;  %v97_v25 = vld [vmem:[%s698_s1 + $0x230] sm:$0xff] }
  0x1f   :  { %167 = vmatpush.msra.mxu1 %v44_v50  ;;  %205 = vmatpush.msra.mxu3 %v78_v62  ;;  %v113_v26 = vld [vmem:[%s698_s1 + $0x2b0] sm:$0xff]  ;;  %v96_v27 = vld [vmem:[%s698_s1 + $0x228] sm:$0xff]  ;;  %v95_v29 = vld [vmem:[%s698_s1 + $0x220] sm:$0xff] }
  0x20   :  { %148 = vmatpush.msra.mxu0 %v27_v53  ;;  %186 = vmatpush.msra.mxu2 %v61_v61  ;;  %v112_v28 = vld [vmem:[%s698_s1 + $0x2a8] sm:$0xff]  ;;  %v111_v30 = vld [vmem:[%s698_s1 + $0x2a0] sm:$0xff]  ;;  %v94_v31 = vld [vmem:[%s698_s1 + $0x218] sm:$0xff] }
  0x21   :  { %168 = vmatpush.msra.mxu1 %v43_v54  ;;  %206 = vmatpush.msra.mxu3 %v77_v2  ;;  %v110_v32 = vld [vmem:[%s698_s1 + $0x298] sm:$0xff]  ;;  %v93_v33 = vld [vmem:[%s698_s1 + $0x210] sm:$0xff]  ;;  %v92_v35 = vld [vmem:[%s698_s1 + $0x208] sm:$0xff] }
  0x22   :  { %213 = vmatpush.msrb.mxu0 %v106_v55  ;;  %187 = vmatpush.msra.mxu2 %v60_v1  ;;  %v109_v34 = vld [vmem:[%s698_s1 + $0x290] sm:$0xff]  ;;  %v108_v36 = vld [vmem:[%s698_s1 + $0x288] sm:$0xff]  ;;  %v91_v37 = vld [vmem:[%s698_s1 + $0x200] sm:$0xff] }
  0x23   :  { %233 = vmatpush.msrb.mxu1 %v122_v56  ;;  %207 = vmatpush.msra.mxu3 %v76_v6  ;;  %v107_v38 = vld [vmem:[%s698_s1 + $0x280] sm:$0xff]  ;;  %v25_v40 = vld [vmem:[%s700_s0 + $0x28] sm:$0xff]  ;;  %v281_v41 = vld [vmem:[%s702_s3 + $0x38] sm:$0xff] }
  0x24   :  { %214 = vmatpush.msrb.mxu0 %v105_v59  ;;  %188 = vmatpush.msra.mxu2 %v59_v5  ;;  %v24_v39 = vld [vmem:[%s700_s0 + $0x20] sm:$0xff]  ;;  %v280_v42 = vld [vmem:[%s702_s3 + $0x30] sm:$0xff]  ;;  %v279_v43 = vld [vmem:[%s702_s3 + $0x28] sm:$0xff] }
  0x25   :  { %234 = vmatpush.msrb.mxu1 %v121_v60  ;;  %189 = vmatmul.f32.vlgmr.msra.gmra.mxu2 %v22_v9  ;;  %v278_v44 = vld [vmem:[%s702_s3 + $0x20] sm:$0xff]  ;;  %v277_v45 = vld [vmem:[%s702_s3 + $0x18] sm:$0xff]  ;;  %v276_v46 = vld [vmem:[%s702_s3 + $0x10] sm:$0xff] }
  0x26   :  { %215 = vmatpush.msrb.mxu0 %v104_v63  ;;  %208 = vmatpush.msra.mxu3 %v75_v10  ;;  %v275_v47 = vld [vmem:[%s702_s3 + $0x8] sm:$0xff]  ;;  %v274_v48 = vld [vmem:[%s702_s3] sm:$0xff] }
  0x27   :  { %235 = vmatpush.msrb.mxu1 %v120_v0  ;;  %267 = vmatpush.msrb.mxu2 %v124_v13  ;;  %v318_v49 = vld [vmem:[%s699_s2] ss:$0 sm:$0xff] }
  0x28   :  { %216 = vmatpush.msrb.mxu0 %v103_v3  ;;  %209 = vmatmul.f32.vlgmr.msra.gmra.mxu3 %v23_v17  ;;  %v319_v1 = vld [vmem:[%s701_s4] ss:$0 sm:$0xff] }
  0x29   :  { %236 = vmatpush.msrb.mxu1 %v119_v4  ;;  %149 = vmatmul.f32.vlgmr.msra.gmra.mxu0 %v20_v14 }
  0x2a   :  { %217 = vmatpush.msrb.mxu0 %v102_v7  ;;  %169 = vmatmul.f32.vlgmr.msra.gmra.mxu1 %v21_v18 }
  0x2b   :  { %237 = vmatpush.msrb.mxu1 %v118_v8  ;;  %268 = vmatpush.msrb.mxu2 %v123_v21 }
  0x2c   :  { %218 = vmatpush.msrb.mxu0 %v101_v11  ;;  %298 = vmatpush.msrb.mxu3 %v281_v41 }
  0x2d   :  { %238 = vmatpush.msrb.mxu1 %v117_v12  ;;  %316 = vmatmul.msk.f32.vlgmr.msrb.gmra.mxu2 %vm129_vm0, %v26_v24 }
  0x2e   :  { %219 = vmatpush.msrb.mxu0 %v100_v15  ;;  %299 = vmatpush.msrb.mxu3 %v280_v42 }
  0x2f   :  { %239 = vmatpush.msrb.mxu1 %v116_v16 }
  0x30   :  { %220 = vmatpush.msrb.mxu0 %v99_v19  ;;  %300 = vmatpush.msrb.mxu3 %v279_v43 }
  0x31   :  { %240 = vmatpush.msrb.mxu1 %v115_v20 }
  0x32   :  { %221 = vmatpush.msrb.mxu0 %v98_v22  ;;  %301 = vmatpush.msrb.mxu3 %v278_v44 }
  0x33   :  { %241 = vmatpush.msrb.mxu1 %v114_v23 }
  0x34   :  { %222 = vmatpush.msrb.mxu0 %v97_v25  ;;  %302 = vmatpush.msrb.mxu3 %v277_v45 }
  0x35   :  { %242 = vmatpush.msrb.mxu1 %v113_v26 }
  0x36   :  { %223 = vmatpush.msrb.mxu0 %v96_v27  ;;  %303 = vmatpush.msrb.mxu3 %v276_v46 }
  0x37   :  { %243 = vmatpush.msrb.mxu1 %v112_v28 }
  0x38   :  { %224 = vmatpush.msrb.mxu0 %v95_v29  ;;  %304 = vmatpush.msrb.mxu3 %v275_v47 }
  0x39   :  { %244 = vmatpush.msrb.mxu1 %v111_v30 }
  0x3a   :  { %225 = vmatpush.msrb.mxu0 %v94_v31  ;;  %305 = vmatpush.msrb.mxu3 %v274_v48 }
  0x3b   :  { %245 = vmatpush.msrb.mxu1 %v110_v32 }
  0x3c   :  { %226 = vmatpush.msrb.mxu0 %v93_v33 }
  0x3d   :  { %246 = vmatpush.msrb.mxu1 %v109_v34 }
  0x3e   :  { %227 = vmatpush.msrb.mxu0 %v92_v35 }
  0x3f   :  { %247 = vmatpush.msrb.mxu1 %v108_v36 }
  0x40   :  { %228 = vmatpush.msrb.mxu0 %v91_v37 }
  0x41   :  { %248 = vmatpush.msrb.mxu1 %v107_v38  ;;  %229 = vmatmul.f32.vlgmr.msrb.gmra.mxu0 %v24_v39 }
  0x42   :  { %249 = vmatmul.f32.vlgmr.msrb.gmra.mxu1 %v25_v40 }
  0xa6   :  { %v150_v50 = vpop.f32.mrf.mxu0 }
  0xa7   :  { %v151_v51 = vadd.f32 %v318_v49, %v150_v50  ;;  %v170_v52 = vpop.f32.mrf.mxu1 }
  0xa8   :  { %v190_v54 = vpop.f32.mrf.mxu2 }
  0xa9   :  { %v171_v53 = vadd.f32 %v170_v52, %v151_v51 }
  0xab   :  { %v191_v55 = vadd.f32 %v190_v54, %v171_v53  ;;  %v210_v56 = vpop.f32.mrf.mxu3 }
  0xad   :  { %v211_v57 = vadd.f32 %v210_v56, %v191_v55 }
  0xb0   :  { %v270_v61 = vpop.f32.mrf.mxu2 }
  0xbe   :  { %v230_v58 = vpop.f32.mrf.mxu0 }
  0xbf   :  { %v250_v59 = vpop.f32.mrf.mxu1  ;;  %v231_v60 = vadd.f32 %v230_v58, %v211_v57 }
  0xc1   :  { %v251_v62 = vadd.f32 %v250_v59, %v231_v60 }
  0xc3   :  { %v271_v63 = vadd.f32 %v270_v61, %v251_v62 }
  0xc5   :  { %v273_v0 = vmax.f32 %v271_v63, 0.0 }
  0xc7   :  { %317 = vmatmul.msk.f32.vlgmr.msrb.gmra.mxu3 %vm286_vm1, %v273_v0 }
 0x14a   :  { %v307_v2 = vpop.f32.mrf.mxu3 }
 0x14b   :  { %v308_v3 = vadd.f32 %v319_v1, %v307_v2 }
 0x14d   :  { %311 = vst.msk [vmem:[%s703_s5] sm:$0xff] %vm310_vm2, %v308_v3 }

</bundles_post_ra>
